<compile_context>
chip_gen: v7x
topology: tpu7x:2x2x1
jax: 0.10.0
libtpu: 0.0.40
codegen_flags: <defaults>
</compile_context>

<pallas_src>
import jax
import jax.numpy as jnp
from jax.experimental import pallas as pl
from jax.experimental.pallas import tpu as pltpu


def projector_kernel(x_ref, w1_ref, b1_ref, w2_ref, b2_ref, o_ref):
    # x_ref : (TM, H) tile in the input dtype (f32 in the demo)
    # w1_ref: (H, HID) bf16 (resident across grid steps)
    # b1_ref: (1, HID) f32;  w2_ref: (1, HID) f32 (W2 transposed to a row)
    # b2_ref: (1,) f32 scalar in SMEM;  o_ref: (1, 1, TM)
    #
    # Cast the activation tile to bf16 *inside* the kernel (saves a full wrapper-side
    # HBM cast pass); MXU accumulates in f32 via preferred_element_type.
    x = x_ref[...].astype(jnp.bfloat16)
    h = jnp.dot(x, w1_ref[...], preferred_element_type=jnp.float32)   # Linear(H, 256)
    h = jnp.maximum(h + b1_ref[...], 0.0)                             # bias + ReLU (VPU)
    # Dropout(0.1): identity at inference time (eval-mode semantics).
    # Linear(256, 1): VPU multiply + cross-lane reduce (avoids an N=1 MXU pass).
    col = jnp.sum(h * w2_ref[...], axis=-1, keepdims=True) + b2_ref[0]   # (TM, 1)
    # Lane-dense store: (TM, 1) -> (1, 1, TM) relayout (XLU; free vs. masked vst.msk).
    o_ref[...] = col.T[None].astype(o_ref.dtype)


def _choose_tile_m(M, requested):
    """Pick the row-tile size.

    Small M: a single full-array tile (block == full dim is always legal; no forced
    second grid step on single-TC chips).  Large M: a big multiple of 128, nudged so
    the number of grid steps is even (balances v7x's two TensorCores; at most one
    128-row reduction, harmless on v5e/v6e).
    """
    if M <= requested:
        return M
    tm = max(128, (requested // 128) * 128)
    if pl.cdiv(M, tm) % 2 == 1:
        for cand in range(tm, 127, -128):
            if pl.cdiv(M, cand) % 2 == 0:
                tm = cand
                break
    return tm


def text_projector(hidden_states, w1, b1, w2, b2, *, tile_m=1024):
    """Applies the projector MLP and squeezes the last dim: [B, S, H] -> [B, S]."""
    B, S, H = hidden_states.shape
    HID = w1.shape[1]
    M = B * S

    tm = _choose_tile_m(M, tile_m)
    n_tiles = pl.cdiv(M, tm)

    # Flattened [M, H] view with H on the lane axis.  No wrapper-side cast and no
    # jnp.pad: the ragged final block (if any) is handled by Pallas, and the padded
    # rows' garbage outputs are dropped by the [:M] slice below.
    x2d = hidden_states.reshape(M, H)

    w1c = w1.astype(jnp.bfloat16)                      # small, one-time cast
    b1_row = b1.reshape(1, HID).astype(jnp.float32)
    w2_row = w2.reshape(1, HID).astype(jnp.float32)    # W2 as a row for the VPU reduce
    b2_s = b2.reshape(1).astype(jnp.float32)

    # VMEM budget: f32 x double buffer + bf16 cast temp + W1 (double buffered) +
    # bias/w2 rows + (tm, HID) f32 intermediate + output buffers, with headroom.
    itemsize = jnp.dtype(hidden_states.dtype).itemsize
    est_vmem = (2 * tm * H * itemsize      # x double buffer
                + tm * H * 2               # in-kernel bf16 cast of x
                + 2 * H * HID * 2          # W1 (double buffered)
                + 8 * HID * 4              # b1 / w2 rows
                + tm * HID * 4             # h intermediate (f32)
                + 4 * tm * itemsize)       # output buffers
    vmem_limit = int(min(max(est_vmem * 3 // 2, 32 << 20), 64 << 20))

    out3d = pl.pallas_call(
        projector_kernel,
        out_shape=jax.ShapeDtypeStruct((n_tiles, 1, tm), hidden_states.dtype),
        grid_spec=pltpu.PrefetchScalarGridSpec(
            num_scalar_prefetch=0,
            grid=(n_tiles,),
            in_specs=[
                pl.BlockSpec((tm, H), lambda i: (i, 0)),              # x tile
                pl.BlockSpec((H, HID), lambda i: (0, 0)),             # W1 (resident)
                pl.BlockSpec((1, HID), lambda i: (0, 0)),             # b1 row
                pl.BlockSpec((1, HID), lambda i: (0, 0)),             # W2 row
                pl.BlockSpec(memory_space=pltpu.MemorySpace.SMEM),    # b2 scalar
            ],
            out_specs=pl.BlockSpec((1, 1, tm), lambda i: (i, 0, 0)),  # lane-dense row
        ),
        compiler_params=pltpu.CompilerParams(
            dimension_semantics=("parallel",),   # shards grid over v7x's 2 TCs
            vmem_limit_bytes=vmem_limit,
        ),
    )(x2d, w1c, b1_row, w2_row, b2_s)

    # Drop any ragged-tail rows and .squeeze(-1) -> [B, S]
    return out3d.reshape(n_tiles * tm)[:M].reshape(B, S)


if __name__ == "__main__":
    # Small shapes consistent with the forward pass:
    #   batch B=2, seq S=8, encoder hidden H=32 (scaled-down roberta hidden),
    #   projector hidden = 256 (as in the module), output dim = 1.
    B, S, H, HID = 2, 8, 32, 256

    key = jax.random.PRNGKey(0)
    k_x, k_w1, k_b1, k_w2, k_b2 = jax.random.split(key, 5)

    # Synthetic `encoded_text.last_hidden_state`
    hidden_states = jax.random.normal(k_x, (B, S, H), dtype=jnp.float32)

    # Deterministic parameter init (Linear(H, 256), Linear(256, 1))
    w1 = jax.random.normal(k_w1, (H, HID), dtype=jnp.float32) * 0.02
    b1 = jax.random.normal(k_b1, (HID,), dtype=jnp.float32) * 0.01
    w2 = jax.random.normal(k_w2, (HID, 1), dtype=jnp.float32) * 0.02
    b2 = jax.random.normal(k_b2, (1,), dtype=jnp.float32) * 0.01

    out = text_projector(hidden_states, w1, b1, w2, b2)
    out = jax.block_until_ready(out)

    # Pure-JAX f32 reference (eval-mode dropout = identity).  The kernel uses bf16
    # matmul operands with f32 accumulation, so compare with a modest tolerance.
    ref = jnp.maximum(hidden_states.reshape(-1, H) @ w1 + b1, 0.0) @ w2 + b2
    ref = ref.reshape(B, S)
    assert out.shape == (B, S)
    err = float(jnp.max(jnp.abs(out - ref)))
    assert jnp.allclose(out, ref, atol=1e-2, rtol=1e-2), err

    print("KERNEL_OK")
</pallas_src>

<mosaic_0001>
module attributes {stable_mosaic.version = 11 : i64} {
  func.func @projector_kernel(%arg0: i32, %arg1: memref<16x32xf32, #tpu.memory_space<vmem>>, %arg2: memref<32x256xbf16, #tpu.memory_space<vmem>>, %arg3: memref<1x256xf32, #tpu.memory_space<vmem>>, %arg4: memref<1x256xf32, #tpu.memory_space<vmem>>, %arg5: memref<1xf32, #tpu.memory_space<smem>>, %arg6: memref<1x1x16xf32, #tpu.memory_space<vmem>>) attributes {dimension_semantics = [#tpu.dimension_semantics<parallel>], iteration_bounds = array<i64: 1>, scalar_prefetch = 0 : i64, scratch_operands = 0 : i64, tpu.core_type = #tpu.core_type<tc>, window_params = [{transform_indices = @transform_0, window_bounds = array<i64: 16, 32>}, {pipeline_mode = #tpu.pipeline_mode<synchronous>, transform_indices = @transform_1, window_bounds = array<i64: 32, 256>}, {pipeline_mode = #tpu.pipeline_mode<synchronous>, transform_indices = @transform_2, window_bounds = array<i64: 1, 256>}, {pipeline_mode = #tpu.pipeline_mode<synchronous>, transform_indices = @transform_3, window_bounds = array<i64: 1, 256>}, {transform_indices = @transform_4, window_bounds = array<i64: 1>}, {transform_indices = @transform_5, window_bounds = array<i64: 1, 1, 16>}]} {
    %c0 = arith.constant 0 : index
    %c0_0 = arith.constant 0 : index
    %0 = vector.load %arg1[%c0, %c0_0] : memref<16x32xf32, #tpu.memory_space<vmem>>, vector<16x32xf32>
    %1 = arith.truncf %0 : vector<16x32xf32> to vector<16x32xbf16>
    %c0_1 = arith.constant 0 : index
    %c0_2 = arith.constant 0 : index
    %2 = vector.load %arg2[%c0_1, %c0_2] : memref<32x256xbf16, #tpu.memory_space<vmem>>, vector<32x256xbf16>
    %cst = arith.constant dense<0.000000e+00> : vector<16x256xf32>
    %3 = tpu.matmul %1, %2, %cst {dimension_numbers = #tpu.dot_dimension_numbers<[1], [0], [0], [1], [0, 0, 1, 1], [], []>} : vector<16x32xbf16>, vector<32x256xbf16>, vector<16x256xf32> -> vector<16x256xf32>
    %c0_3 = arith.constant 0 : index
    %c0_4 = arith.constant 0 : index
    %4 = vector.load %arg3[%c0_3, %c0_4] : memref<1x256xf32, #tpu.memory_space<vmem>>, vector<1x256xf32>
    %5 = vector.broadcast %4 : vector<1x256xf32> to vector<16x256xf32>
    %6 = arith.addf %3, %5 : vector<16x256xf32>
    %cst_5 = arith.constant 0.000000e+00 : f32
    %7 = vector.broadcast %cst_5 : f32 to vector<16x256xf32>
    %8 = arith.maximumf %6, %7 : vector<16x256xf32>
    %c0_6 = arith.constant 0 : index
    %c0_7 = arith.constant 0 : index
    %9 = vector.load %arg4[%c0_6, %c0_7] : memref<1x256xf32, #tpu.memory_space<vmem>>, vector<1x256xf32>
    %10 = vector.broadcast %9 : vector<1x256xf32> to vector<16x256xf32>
    %11 = arith.mulf %8, %10 : vector<16x256xf32>
    %cst_8 = arith.constant dense<0.000000e+00> : vector<16xf32>
    %12 = vector.multi_reduction <add>, %11, %cst_8 [1] : vector<16x256xf32> to vector<16xf32>
    %13 = vector.shape_cast %12 : vector<16xf32> to vector<16x1xf32>
    %c0_9 = arith.constant 0 : index
    %14 = memref.load %arg5[%c0_9] : memref<1xf32, #tpu.memory_space<smem>>
    %15 = vector.broadcast %14 : f32 to vector<16x1xf32>
    %16 = arith.addf %13, %15 : vector<16x1xf32>
    %17 = tpu.transpose %16, [1, 0] : vector<16x1xf32> -> vector<1x16xf32>
    %18 = vector.shape_cast %17 : vector<1x16xf32> to vector<1x1x16xf32>
    %c0_10 = arith.constant 0 : index
    %c0_11 = arith.constant 0 : index
    %c0_12 = arith.constant 0 : index
    %19 = vector.load %arg6[%c0_10, %c0_11, %c0_12] : memref<1x1x16xf32, #tpu.memory_space<vmem>>, vector<1x1x16xf32>
    tpu.vector_store %arg6[%c0_10, %c0_11, %c0_12], %18 {strides = array<i32>} : memref<1x1x16xf32, #tpu.memory_space<vmem>>, vector<1x1x16xf32>,
    return
  }
  func.func @transform_0(%arg0: i32) -> (i32, i32) {
    %c0_i32 = arith.constant 0 : i32
    %c0_i32_0 = arith.constant 0 : i32
    return %arg0, %c0_i32 : i32, i32
  }
  func.func @transform_1(%arg0: i32) -> (i32, i32) {
    %c0_i32 = arith.constant 0 : i32
    %c0_i32_0 = arith.constant 0 : i32
    %c0_i32_1 = arith.constant 0 : i32
    return %c0_i32, %c0_i32_0 : i32, i32
  }
  func.func @transform_2(%arg0: i32) -> (i32, i32) {
    %c0_i32 = arith.constant 0 : i32
    %c0_i32_0 = arith.constant 0 : i32
    %c0_i32_1 = arith.constant 0 : i32
    return %c0_i32, %c0_i32_0 : i32, i32
  }
  func.func @transform_3(%arg0: i32) -> (i32, i32) {
    %c0_i32 = arith.constant 0 : i32
    %c0_i32_0 = arith.constant 0 : i32
    %c0_i32_1 = arith.constant 0 : i32
    return %c0_i32, %c0_i32_0 : i32, i32
  }
  func.func @transform_4(%arg0: i32) -> i32 {
    %c0_i32 = arith.constant 0 : i32
    %c0_i32_0 = arith.constant 0 : i32
    return %c0_i32 : i32
  }
  func.func @transform_5(%arg0: i32) -> (i32, i32, i32) {
    %c0_i32 = arith.constant 0 : i32
    %c0_i32_0 = arith.constant 0 : i32
    %c0_i32_1 = arith.constant 0 : i32
    return %arg0, %c0_i32, %c0_i32_0 : i32, i32, i32
  }
}

</mosaic_0001>

<bundles_post_ra>
// kernel: tpu_custom_call.1
= control target key start
LH: loop header
LB: loop body
LE: loop exit
PB: predicated region body
PF: predicated region fallthrough
CT: control target
= control target key end

     0   :  { %11 = vsyncpa [#allocation4], 0  ;;  %s388_s0 = inlined_call_operand.hbm [shape: f32[16,32], index: 0, kind: input, shape index: {}]   ;;  %s389_s1 = inlined_call_operand.hbm [shape: bf16[32,256], index: 1, kind: input, shape index: {}]   ;;  %s390_s2 = inlined_call_operand.vmem [shape: f32[1,256], index: 2, kind: input, shape index: {}]   ;;  %s391_s3 = inlined_call_operand.vmem [shape: f32[1,256], index: 3, kind: input, shape index: {}]   ;;  %s392_s4 = inlined_call_operand.<no memory space> [shape: f32[1], index: 4, kind: input, shape index: {}]   ;;  %s393_s5 = inlined_call_operand.hbm [shape: f32[1,1,16], index: 5, kind: output, shape index: {}]  }
   0x1   :  { %12 = vsyncpa [#allocation7], 0 }
   0x2   :  { %13 = vsyncpa [#allocation5], 0  ;;  %s307_s18 = smov [#allocation3]   ;;  %s235_s22 = scalar_lea.hbm %s388_s0, 256 }
   0x3   :  { %s19_s19 = sshll.u32 %s307_s18, 4  ;;  %p236_p0 = scmp.ne.s32.totalorder %s388_s0, %s235_s22  ;;  %s20_s19 = int_to_ptr.vmem [resolvable:$true] %s19_s19 }
   0x4   :  { %p239_p1 = scmp.lt.u32.totalorder %s235_s22, %s388_s0 }
   0x6   :  { %p241_p2 = pnand %p239_p1, %p236_p0 }
   0x8   :  { %244 = shalt.err (!%p241_p2)
}
   0x9   :  { %s245_s27 = scalar_lea.vmem %s20_s19, 256  ;;  %p250_p4 = scmp.lt.s32.totalorder %s20_s19, %s20_s19 }
   0xa   :  { %p246_p3 = scmp.ne.s32.totalorder %s20_s19, %s245_s27  ;;  %p251_p5 = scmp.lt.s32.totalorder %s245_s27, %s245_s27 }
   0xc   :  { %p252_p6 = por %p251_p5, %p250_p4 }
   0xe   :  { %p253_p7 = pnand %p252_p6, %p246_p3 }
  0x10   :  { %256 = shalt.err (!%p253_p7)
}
  0x11   :  { %s308_s28 = smov 128   ;;  %s309_s29 = smov 8  }
  0x12   :  { %25 = dma.hbm_to_vmem [thread:$0]  %s388_s0, 256, %s20_s19, [#allocation4], %s308_s28, %s308_s28, %s309_s29  }
  0x13   :  { %s310_s7 = smov [#allocation6]   ;;  %s257_s11 = scalar_lea.hbm %s389_s1, 512 }
  0x14   :  { %s31_s8 = sshll.u32 %s310_s7, 4  ;;  %p258_p8 = scmp.ne.s32.totalorder %s389_s1, %s257_s11  ;;  %s32_s8 = int_to_ptr.vmem [resolvable:$true] %s31_s8 }
  0x15   :  { %p261_p9 = scmp.lt.u32.totalorder %s257_s11, %s389_s1 }
  0x17   :  { %p263_p10 = pnand %p261_p9, %p258_p8 }
  0x19   :  { %266 = shalt.err (!%p263_p10)
}
  0x1a   :  { %s267_s16 = scalar_lea.vmem %s32_s8, 512  ;;  %p272_p12 = scmp.lt.s32.totalorder %s32_s8, %s32_s8 }
  0x1b   :  { %p268_p11 = scmp.ne.s32.totalorder %s32_s8, %s267_s16  ;;  %p273_p13 = scmp.lt.s32.totalorder %s267_s16, %s267_s16 }
  0x1d   :  { %p274_p0 = por %p273_p13, %p272_p12 }
  0x1f   :  { %p275_p1 = pnand %p274_p0, %p268_p11 }
  0x21   :  { %278 = shalt.err (!%p275_p1)
}
  0x22   :  { %37 = dma.hbm_to_vmem [thread:$0]  %s389_s1, 512, %s32_s8, [#allocation7], %s308_s28, %s308_s28, %s309_s29  }
  0x23   :  { %301 = dma.done.wait [#allocation4], 256  }
  0x24   :  { %302 = vsyncadd [#allocation4], 4294967040 }
  0x25   :  { %303 = dma.done.wait [#allocation7], 512  }
  0x26   :  { %304 = vsyncadd [#allocation7], 4294966784  ;;  %v311_v0 = vmov 0   ;;  %v229_v1 = vld [vmem:[#allocation6 + $0x4] ss:$8 sps:$4 sm:$0xff]   ;;  %v51_v5 = vld [vmem:[#allocation3] sm:$0xff]  ;;  %v60_v8 = vlaneseq  ;;  %v164_v36 = vstv %s392_s4 }
  0x27   :  { %126 = vmatprep.mubr.bf16.mxu0 %v311_v0  ;;  %v231_v2 = vld [vmem:[#allocation6] ss:$8 sps:$4 sm:$0xff]   ;;  %94 = vmatprep.subr.bf16.mxu0 %v229_v1  ;;  %v232_v3 = vld [vmem:[#allocation6 + $0x14] ss:$8 sps:$4 sm:$0xff]   ;;  %v234_v4 = vld [vmem:[#allocation6 + $0x10] ss:$8 sps:$4 sm:$0xff]  }
  0x28   :  { %95 = vmatpush1.bf16.msra.mxu0 %v231_v2  ;;  %v52_v6 = vld [vmem:[#allocation3 + $0x8] sm:$0xff]  ;;  %vm90_vm0 = vcmask 261120   ;;  %v61_v9 = vshrl.u32 %v60_v8, 7  ;;  %v58_v11 = vld [vmem:[%s390_s2] sm:$0x3]  ;;  %s312_s21 = smov [#allocation8]  }
  0x29   :  { %96 = vmatprep.subr.bf16.mxu0 %v232_v3  ;;  %v53_v7 = vpack.c.bf16 %v52_v6, %v51_v5  ;;  %v141_v15 = vld [vmem:[%s391_s3] sm:$0x3]  ;;  %s207_s22 = sshll.u32 %s312_s21, 4  ;;  %vm199_vm1 = vcmask 122880   ;;  %s208_s22 = int_to_ptr.vmem [resolvable:$true] %s207_s22 }
  0x2a   :  { %v62_v10 = vsub.s32 0, %v61_v9  ;;  %v66_v12 = vsub.s32 1, %v61_v9  ;;  %s279_s23 = scalar_lea.vmem %s208_s22, 16  ;;  %s283_s24 = scalar_lea.vmem %s208_s22, 32 }
  0x2b   :  { %p280_p2 = scmp.ne.s32.totalorder %s208_s22, %s279_s23  ;;  %p284_p3 = scmp.lt.s32.totalorder %s208_s22, %s208_s22 }
  0x2c   :  { %97 = vmatpush1.bf16.msra.mxu0 %v234_v4  ;;  %v63_v13 = vrot.slane %v58_v11, %v62_v10  ;;  %v67_v14 = vrot.slane %v58_v11, %v66_v12  ;;  %v146_v19 = vrot.slane %v141_v15, %v62_v10  ;;  %v150_v22 = vrot.slane %v141_v15, %v66_v12  ;;  %p285_p4 = scmp.lt.s32.totalorder %s283_s24, %s279_s23 }
  0x2e   :  { %p286_p5 = por %p285_p4, %p284_p3 }
  0x2f   :  { %221 = vmatmul.mubr.msk.bf16.vlgmr.msra.gmra.mrb[0].mxu0 %vm90_vm0, %v53_v7 }
  0x30   :  { %p287_p6 = pnand %p286_p5, %p280_p2 }
 0x102   :  { %v128_v16 = vpop.f32.mrb[0].mxu0 }
 0x103   :  { %v129_v17 = vadd.f32 %v128_v16, %v63_v13  ;;  %v130_v18 = vpop.f32.mrb[1].mxu0 }
 0x104   :  { %v131_v20 = vadd.f32 %v130_v18, %v67_v14  ;;  %v132_v21 = vpop.f32.mrb[2].mxu0 }
 0x105   :  { %v137_v23 = vmax.f32 %v129_v17, 0.0  ;;  %v133_v24 = vadd.f32 %v132_v21, %v63_v13  ;;  %v134_v25 = vpop.f32.mrb[3].mxu0 }
 0x106   :  { %v138_v26 = vmax.f32 %v131_v20, 0.0  ;;  %v135_v27 = vadd.f32 %v134_v25, %v67_v14 }
 0x107   :  { %v139_v28 = vmax.f32 %v133_v24, 0.0  ;;  %v153_v29 = vmul.f32 %v146_v19, %v137_v23 }
 0x108   :  { %v140_v30 = vmax.f32 %v135_v27, 0.0  ;;  %v154_v31 = vmul.f32 %v150_v22, %v138_v26 }
 0x109   :  { %v155_v32 = vmul.f32 %v146_v19, %v139_v28 }
 0x10a   :  { %v156_v33 = vmul.f32 %v150_v22, %v140_v30  ;;  %v157_v34 = vadd.f32 %v154_v31, %v153_v29 }
 0x10c   :  { %158 = vadd.xlane.f32.xlu0 %v157_v34  ;;  %v160_v35 = vadd.f32 %v156_v33, %v155_v32 }
 0x110   :  { %161 = vadd.xlane.f32.xlu0 %v160_v35 }
 0x199   :  { %v159_v37 = vpop.xlane.xlu0 %158 }
 0x19a   :  { %v165_v38 = vadd.f32 %v164_v36, %v159_v37 }
 0x19c   :  { %167 = vxpose.xlu1.b32.start [1/2] (short) (narrow) %v165_v38, 8 }
 0x19d   :  { %v162_v39 = vpop.xlane.xlu0 %161 }
 0x19e   :  { %v166_v40 = vadd.f32 %v164_v36, %v162_v39 }
 0x1a0   :  { %168 = vxpose.xlu1.b32.end [2/2] (short) (narrow) %v166_v40, 8 }
 0x21c   :  { %v183_v41 = vpop.trf.xlu1 }
 0x21d   :  { %200 = vst.msk [vmem:[#allocation8] sm:$0x1] %vm199_vm1, %v183_v41 }
 0x21e   :  { %290 = shalt.err (!%p287_p6)
}
 0x21f   :  { %s291_s26 = scalar_lea.hbm %s393_s5, 16 }
 0x220   :  { %p292_p7 = scmp.ne.s32.totalorder %s393_s5, %s291_s26  ;;  %p295_p8 = scmp.lt.u32.totalorder %s291_s26, %s393_s5 }
 0x222   :  { %p297_p9 = pnand %p295_p8, %p292_p7 }
 0x224   :  { %300 = shalt.err (!%p297_p9)
}
 0x225   :  { %210 = dma.vmem_to_hbm [thread:$0]  %s208_s22, 16, %s393_s5, [#allocation5]  }
 0x226   :  { %305 = dma.done.wait [#allocation5], 16  }
 0x227   :  { %306 = vsyncadd [#allocation5], 4294967280 }
 0x228   :  { %214 = vsyncpa [#allocation4], 1 }
 0x229   :  { %215 = vsyncpa [#allocation7], 1 }
 0x22a   :  { %216 = vsyncpa [#allocation5], 1 }

</bundles_post_ra>
